<compile_context>
chip_gen: v6e
topology: v6e:2x2x1
jax: 0.10.0
libtpu: 0.0.40
codegen_flags: <defaults>
</compile_context>

<pallas_src>
import math
import functools

import jax
import jax.numpy as jnp
from jax import lax
from jax.experimental import pallas as pl
from jax.experimental.pallas import tpu as pltpu

_NEG_INF = -1e30  # finite "minus infinity" (avoids NaNs in the online softmax)


def _fit_tile(dim, target):
    """Largest tile <= target that evenly divides dim (falls back to full dim)."""
    if dim <= target:
        return dim
    t = target
    while t > 1 and dim % t != 0:
        t //= 2
    return t if dim % t == 0 else dim


# ---------------------------------------------------------------------------
# Tiled linear kernel: out = x @ w_t   (w_t is the pre-transposed (K, N) weight)
# ---------------------------------------------------------------------------

def _linear_kernel(x_ref, w_ref, o_ref, acc_ref, *, compute_dtype):
    @pl.when(pl.program_id(2) == 0)
    def _init():
        acc_ref[...] = jnp.zeros_like(acc_ref)

    acc_ref[...] += jnp.dot(
        x_ref[...].astype(compute_dtype),
        w_ref[...].astype(compute_dtype),
        preferred_element_type=jnp.float32,
    )

    @pl.when(pl.program_id(2) == pl.num_programs(2) - 1)
    def _finalize():
        o_ref[...] = acc_ref[...].astype(o_ref.dtype)


def linear_no_bias(x2d, w_t, *, compute_dtype=jnp.bfloat16, tm=256, tn=256, tk=512):
    """x2d: (M, K); w_t: (K, N) pre-transposed weight. Returns (M, N) in x2d.dtype."""
    M, K = x2d.shape
    Kw, N = w_t.shape
    assert K == Kw
    tm = _fit_tile(M, tm)
    tn = _fit_tile(N, tn)
    tk = _fit_tile(K, tk)
    grid = (M // tm, N // tn, K // tk)
    kernel = functools.partial(_linear_kernel, compute_dtype=compute_dtype)
    return pl.pallas_call(
        kernel,
        out_shape=jax.ShapeDtypeStruct((M, N), x2d.dtype),
        grid=grid,
        in_specs=[
            pl.BlockSpec((tm, tk), lambda i, j, k: (i, k)),
            pl.BlockSpec((tk, tn), lambda i, j, k: (k, j)),
        ],
        out_specs=pl.BlockSpec((tm, tn), lambda i, j, k: (i, j)),
        scratch_shapes=[pltpu.VMEM((tm, tn), jnp.float32)],
        compiler_params=pltpu.CompilerParams(
            dimension_semantics=("parallel", "parallel", "arbitrary")),
    )(x2d, w_t)


# ---------------------------------------------------------------------------
# Flash-style attention kernel with in-kernel RoPE and causal masking
# ---------------------------------------------------------------------------

def _rotate_half(x, half):
    # rotate_half(x) = cat(-x[..., half:], x[..., :half]) on the lane axis.
    return jnp.concatenate([-x[:, half:], x[:, :half]], axis=1)


def _flash_attn_kernel(q_ref, k_ref, v_ref, cos_q_ref, sin_q_ref,
                       cos_k_ref, sin_k_ref, o_ref,
                       m_ref, l_ref, acc_ref, *, scale, causal):
    qi = pl.program_id(2)
    ki = pl.program_id(3)
    tq = q_ref.shape[1]
    tkv = k_ref.shape[1]
    half = q_ref.shape[2] // 2

    @pl.when(ki == 0)
    def _init():
        m_ref[...] = jnp.full_like(m_ref, _NEG_INF)
        l_ref[...] = jnp.zeros_like(l_ref)
        acc_ref[...] = jnp.zeros_like(acc_ref)

    def _compute():
        # 1/sqrt(D) folded into q (linear, so equivalent to scaling the scores).
        q = q_ref[0].astype(jnp.float32) * scale            # (tq, D)
        k = k_ref[0].astype(jnp.float32)                    # (tkv, D)

        # RoPE in f32.
        qe = q * cos_q_ref[...] + _rotate_half(q, half) * sin_q_ref[...]
        ke = k * cos_k_ref[...] + _rotate_half(k, half) * sin_k_ref[...]

        # QK^T contracting the last dims (no explicit transpose of K), bf16 MXU.
        s = lax.dot_general(
            qe.astype(jnp.bfloat16), ke.astype(jnp.bfloat16),
            (((1,), (1,)), ((), ())),
            preferred_element_type=jnp.float32)             # (tq, tkv)

        if causal:
            rows = qi * tq + lax.broadcasted_iota(jnp.int32, s.shape, 0)
            cols = ki * tkv + lax.broadcasted_iota(jnp.int32, s.shape, 1)
            s = jnp.where(cols <= rows, s, _NEG_INF)

        m_prev = m_ref[...]
        m_new = jnp.maximum(m_prev, jnp.max(s, axis=-1, keepdims=True))
        alpha = jnp.exp(m_prev - m_new)
        p = jnp.exp(s - m_new)
        l_ref[...] = alpha * l_ref[...] + jnp.sum(p, axis=-1, keepdims=True)
        acc_ref[...] = alpha * acc_ref[...] + jnp.dot(
            p.astype(jnp.bfloat16), v_ref[0].astype(jnp.bfloat16),
            preferred_element_type=jnp.float32)
        m_ref[...] = m_new

    if causal:
        # Skip KV tiles that lie entirely in the future of this Q tile.
        @pl.when(ki * tkv <= qi * tq + (tq - 1))
        def _visible():
            _compute()
    else:
        _compute()

    @pl.when(ki == pl.num_programs(3) - 1)
    def _finalize():
        o_ref[0] = (acc_ref[...] / l_ref[...]).astype(o_ref.dtype)


def attention_core(proj, cos, sin, num_heads, head_dim, *,
                   causal, tq=128, tkv=128):
    """proj: (B, S, 3*H) packed q|k|v; cos/sin: (S, D). Returns (B, S, H)."""
    B, S, H3 = proj.shape
    NH, D = num_heads, head_dim
    H = NH * D
    assert H3 == 3 * H
    tq = _fit_tile(S, tq)
    tkv = _fit_tile(S, tkv)
    grid = (B, NH, S // tq, S // tkv)
    scale = 1.0 / math.sqrt(D)
    kernel = functools.partial(_flash_attn_kernel, scale=scale, causal=causal)
    return pl.pallas_call(
        kernel,
        out_shape=jax.ShapeDtypeStruct((B, S, H), proj.dtype),
        grid=grid,
        in_specs=[
            # Per-head (tq, D) / (tkv, D) windows sliced directly out of the
            # packed projection: q at block col h, k at NH+h, v at 2*NH+h.
            pl.BlockSpec((1, tq, D), lambda b, h, qi, ki: (b, qi, h)),
            pl.BlockSpec((1, tkv, D), lambda b, h, qi, ki: (b, ki, NH + h)),
            pl.BlockSpec((1, tkv, D), lambda b, h, qi, ki: (b, ki, 2 * NH + h)),
            pl.BlockSpec((tq, D), lambda b, h, qi, ki: (qi, 0)),    # cos (q rows)
            pl.BlockSpec((tq, D), lambda b, h, qi, ki: (qi, 0)),    # sin (q rows)
            pl.BlockSpec((tkv, D), lambda b, h, qi, ki: (ki, 0)),   # cos (k rows)
            pl.BlockSpec((tkv, D), lambda b, h, qi, ki: (ki, 0)),   # sin (k rows)
        ],
        out_specs=pl.BlockSpec((1, tq, D), lambda b, h, qi, ki: (b, qi, h)),
        scratch_shapes=[
            pltpu.VMEM((tq, 1), jnp.float32),   # running max
            pltpu.VMEM((tq, 1), jnp.float32),   # running denominator
            pltpu.VMEM((tq, D), jnp.float32),   # output accumulator
        ],
        compiler_params=pltpu.CompilerParams(
            dimension_semantics=("parallel", "parallel", "parallel", "arbitrary")),
    )(proj, proj, proj, cos, sin, cos, sin)


# ---------------------------------------------------------------------------
# Module wrapper (parameter setup + glue reshapes in plain JAX)
# ---------------------------------------------------------------------------

class AttentionPallas:
    def __init__(self, hidden_size, num_heads, max_position_embeddings, key,
                 base=10000.0, compute_dtype=jnp.bfloat16):
        assert hidden_size % num_heads == 0
        self.hidden_size = hidden_size
        self.num_heads = num_heads
        self.head_dim = hidden_size // num_heads
        self.compute_dtype = compute_dtype

        k1, k2 = jax.random.split(key)
        w_scale = 1.0 / math.sqrt(hidden_size)
        # nn.Linear weights: (out_features, in_features), no bias.
        self.w_pack = (jax.random.normal(k1, (3 * hidden_size, hidden_size),
                                         jnp.float32) * w_scale)
        self.w_o = (jax.random.normal(k2, (hidden_size, hidden_size),
                                      jnp.float32) * w_scale)
        # Pre-transposed (K, N), compute-dtype copies used by the kernels
        # (done once here instead of a per-call transpose/cast).
        self.w_pack_t = self.w_pack.T.astype(compute_dtype)
        self.w_o_t = self.w_o.T.astype(compute_dtype)

        # RotaryEmbedding caches.
        dim = self.head_dim
        inv_freq = 1.0 / (base ** (jnp.arange(0, dim, 2, dtype=jnp.float32) / dim))
        t = jnp.arange(max_position_embeddings, dtype=jnp.float32)
        freqs = jnp.outer(t, inv_freq)
        emb = jnp.concatenate([freqs, freqs], axis=-1)
        self.cos_cached = jnp.cos(emb)                      # (max_pos, D)
        self.sin_cached = jnp.sin(emb)                      # (max_pos, D)

    def __call__(self, hidden_states, attention_mask=None, position_ids=None):
        # TODO(synk): past_key_value / use_cache / output_attentions paths not implemented.
        # TODO(synk): attention_mask is interpreted as the standard causal decoder mask
        #             and regenerated in-kernel (iota compare); arbitrary additive masks
        #             are not DMA'd to avoid the S^2 HBM traffic.
        B, S, H = hidden_states.shape
        NH, D = self.num_heads, self.head_dim

        x2d = hidden_states.reshape(B * S, H)
        proj = linear_no_bias(
            x2d, self.w_pack_t, compute_dtype=self.compute_dtype
        ).reshape(B, S, 3 * H)                                # packed q|k|v

        if position_ids is None:
            position_ids = jnp.arange(S)
        cos = self.cos_cached[position_ids]                   # (S, D)
        sin = self.sin_cached[position_ids]                   # (S, D)

        causal = attention_mask is not None
        attn = attention_core(proj, cos, sin, NH, D, causal=causal)     # (B, S, H)

        out2d = linear_no_bias(attn.reshape(B * S, H), self.w_o_t,
                               compute_dtype=self.compute_dtype)
        return out2d.reshape(B, S, H)


# ---------------------------------------------------------------------------
# Plain-JAX reference (mirrors the kernel's bf16-matmul / f32-accumulate math)
# ---------------------------------------------------------------------------

def reference_forward(mod, x, position_ids, causal=True):
    B, S, H = x.shape
    NH, D = mod.num_heads, mod.head_dim
    cdt = mod.compute_dtype
    wp = mod.w_pack_t   # (H, 3H) bf16
    wo = mod.w_o_t      # (H, H)  bf16

    proj = jnp.einsum("bsk,kn->bsn", x.astype(cdt), wp,
                      preferred_element_type=jnp.float32)
    q = proj[..., :H].reshape(B, S, NH, D).transpose(0, 2, 1, 3)
    k = proj[..., H:2 * H].reshape(B, S, NH, D).transpose(0, 2, 1, 3)
    v = proj[..., 2 * H:].reshape(B, S, NH, D).transpose(0, 2, 1, 3)

    cos = mod.cos_cached[position_ids][None, None]   # (1, 1, S, D)
    sin = mod.sin_cached[position_ids][None, None]

    def rotate_half(t):
        return jnp.concatenate([-t[..., D // 2:], t[..., :D // 2]], axis=-1)

    scale = 1.0 / math.sqrt(D)
    qe = (q * cos + rotate_half(q) * sin) * scale
    ke = k * cos + rotate_half(k) * sin
    scores = jnp.einsum("bhqd,bhkd->bhqk", qe.astype(cdt), ke.astype(cdt),
                        preferred_element_type=jnp.float32)
    if causal:
        rows = jnp.arange(S)[:, None]
        cols = jnp.arange(S)[None, :]
        scores = jnp.where(cols <= rows, scores, _NEG_INF)
    p = jax.nn.softmax(scores, axis=-1)
    o = jnp.einsum("bhqk,bhkd->bhqd", p.astype(cdt), v.astype(cdt),
                   preferred_element_type=jnp.float32)
    o = o.transpose(0, 2, 1, 3).reshape(B, S, H)
    return jnp.einsum("bsk,kn->bsn", o.astype(cdt), wo,
                      preferred_element_type=jnp.float32)


# ---------------------------------------------------------------------------

if __name__ == "__main__":
    # Small but lane-aligned shapes: head_dim=128 (the real Baichuan2 head_dim),
    # 2 heads, batch 2, seq 256 so the flash kernel exercises multiple KV tiles
    # and the causal tile-skip path.
    B, S, NH, D = 2, 256, 2, 128
    H = NH * D
    MAX_POS = 512

    key = jax.random.PRNGKey(0)
    k_param, k_x = jax.random.split(key)

    mod = AttentionPallas(H, NH, MAX_POS, k_param)

    x = jax.random.normal(k_x, (B, S, H), jnp.float32)
    position_ids = jnp.arange(S)

    # The model's standard causal decoder mask (additive); the kernel regenerates
    # it internally instead of DMA-ing this (B, 1, S, S) tensor.
    neg = jnp.finfo(jnp.float32).min
    causal_bias = jnp.where(jnp.tril(jnp.ones((S, S), jnp.bool_)), 0.0, neg)
    mask = jnp.broadcast_to(causal_bias[None, None], (B, 1, S, S))

    out = mod(x, attention_mask=mask, position_ids=position_ids)
    out = jax.block_until_ready(out)

    ref = reference_forward(mod, x, position_ids, causal=True)
    assert out.shape == (B, S, H)
    max_err = float(jnp.max(jnp.abs(out - ref)))
    assert jnp.allclose(out, ref, atol=3e-2, rtol=3e-2), (
        f"mismatch vs reference (max abs err {max_err})")

    print("KERNEL_OK")
</pallas_src>

<mosaic_0001>
module attributes {stable_mosaic.version = 11 : i64} {
  func.func @_linear_kernel(%arg0: i32, %arg1: i32, %arg2: i32, %arg3: memref<256x256xf32, #tpu.memory_space<vmem>>, %arg4: memref<256x256xbf16, #tpu.memory_space<vmem>>, %arg5: memref<256x256xf32, #tpu.memory_space<vmem>>, %arg6: memref<256x256xf32, #tpu.memory_space<vmem>>) attributes {dimension_semantics = [#tpu.dimension_semantics<parallel>, #tpu.dimension_semantics<parallel>, #tpu.dimension_semantics<arbitrary>], iteration_bounds = array<i64: 2, 3, 1>, scalar_prefetch = 0 : i64, scratch_operands = 1 : i64, tpu.core_type = #tpu.core_type<tc>, window_params = [{transform_indices = @transform_0, window_bounds = array<i64: 256, 256>}, {transform_indices = @transform_1, window_bounds = array<i64: 256, 256>}, {transform_indices = @transform_2, window_bounds = array<i64: 256, 256>}]} {
    %c0_i32 = arith.constant 0 : i32
    %0 = arith.cmpi eq, %arg2, %c0_i32 : i32
    %1 = arith.extui %0 : i1 to i32
    %c0_i32_0 = arith.constant 0 : i32
    %2 = arith.cmpi ne, %1, %c0_i32_0 : i32
    scf.if %2 {
      %cst_10 = arith.constant 0.000000e+00 : f32
      %13 = vector.broadcast %cst_10 : f32 to vector<256x256xf32>
      %c0_11 = arith.constant 0 : index
      %c0_12 = arith.constant 0 : index
      %14 = vector.load %arg6[%c0_11, %c0_12] : memref<256x256xf32, #tpu.memory_space<vmem>>, vector<256x256xf32>
      tpu.vector_store %arg6[%c0_11, %c0_12], %13 {strides = array<i32>} : memref<256x256xf32, #tpu.memory_space<vmem>>, vector<256x256xf32>,
    } else {
    }
    %c0 = arith.constant 0 : index
    %c0_1 = arith.constant 0 : index
    %3 = vector.load %arg6[%c0, %c0_1] : memref<256x256xf32, #tpu.memory_space<vmem>>, vector<256x256xf32>
    %c0_2 = arith.constant 0 : index
    %c0_3 = arith.constant 0 : index
    %4 = vector.load %arg3[%c0_2, %c0_3] : memref<256x256xf32, #tpu.memory_space<vmem>>, vector<256x256xf32>
    %5 = arith.truncf %4 : vector<256x256xf32> to vector<256x256xbf16>
    %c0_4 = arith.constant 0 : index
    %c0_5 = arith.constant 0 : index
    %6 = vector.load %arg4[%c0_4, %c0_5] : memref<256x256xbf16, #tpu.memory_space<vmem>>, vector<256x256xbf16>
    %cst = arith.constant dense<0.000000e+00> : vector<256x256xf32>
    %7 = tpu.matmul %5, %6, %cst {dimension_numbers = #tpu.dot_dimension_numbers<[1], [0], [0], [1], [0, 0, 1, 1], [], []>} : vector<256x256xbf16>, vector<256x256xbf16>, vector<256x256xf32> -> vector<256x256xf32>
    %8 = arith.addf %3, %7 : vector<256x256xf32>
    %c0_6 = arith.constant 0 : index
    %c0_7 = arith.constant 0 : index
    %9 = vector.load %arg6[%c0_6, %c0_7] : memref<256x256xf32, #tpu.memory_space<vmem>>, vector<256x256xf32>
    tpu.vector_store %arg6[%c0_6, %c0_7], %8 {strides = array<i32>} : memref<256x256xf32, #tpu.memory_space<vmem>>, vector<256x256xf32>,
    %c0_i32_8 = arith.constant 0 : i32
    %10 = arith.cmpi eq, %arg2, %c0_i32_8 : i32
    %11 = arith.extui %10 : i1 to i32
    %c0_i32_9 = arith.constant 0 : i32
    %12 = arith.cmpi ne, %11, %c0_i32_9 : i32
    scf.if %12 {
      %c0_10 = arith.constant 0 : index
      %c0_11 = arith.constant 0 : index
      %13 = vector.load %arg6[%c0_10, %c0_11] : memref<256x256xf32, #tpu.memory_space<vmem>>, vector<256x256xf32>
      %c0_12 = arith.constant 0 : index
      %c0_13 = arith.constant 0 : index
      %14 = vector.load %arg5[%c0_12, %c0_13] : memref<256x256xf32, #tpu.memory_space<vmem>>, vector<256x256xf32>
      tpu.vector_store %arg5[%c0_12, %c0_13], %13 {strides = array<i32>} : memref<256x256xf32, #tpu.memory_space<vmem>>, vector<256x256xf32>,
    } else {
    }
    return
  }
  func.func @transform_0(%arg0: i32, %arg1: i32, %arg2: i32) -> (i32, i32) {
    %c0_i32 = arith.constant 0 : i32
    return %arg0, %arg2 : i32, i32
  }
  func.func @transform_1(%arg0: i32, %arg1: i32, %arg2: i32) -> (i32, i32) {
    %c0_i32 = arith.constant 0 : i32
    return %arg2, %arg1 : i32, i32
  }
  func.func @transform_2(%arg0: i32, %arg1: i32, %arg2: i32) -> (i32, i32) {
    %c0_i32 = arith.constant 0 : i32
    return %arg0, %arg1 : i32, i32
  }
}

</mosaic_0001>

<bundles_post_ra>
// kernel: tpu_custom_call.1
= control target key start
LH: loop header
LB: loop body
LE: loop exit
PB: predicated region body
PF: predicated region fallthrough
CT: control target
= control target key end

     0   :  { %s2210_s0 = inlined_call_operand.hbm [shape: f32[512,256], index: 0, kind: input, shape index: {}]   ;;  %s2211_s1 = inlined_call_operand.hbm [shape: bf16[256,768], index: 1, kind: input, shape index: {}]   ;;  %s2212_s2 = inlined_call_operand.hbm [shape: f32[512,768], index: 2, kind: output, shape index: {}]  }
   0x1   :  { %2220 = sst [smem:[#allocation18_spill]] %s2210_s0 }
   0x2   :  { %2221 = sst [smem:[#allocation19_spill]] %s2212_s2 }
   0x3   :  { %7 = vsyncpa [#allocation4], 0 }
   0x4   :  { %9 = vsyncpa [#allocation4 + $0x1], 0 }
   0x5   :  { %10 = vsyncpa [#allocation7], 0 }
   0x6   :  { %12 = vsyncpa [#allocation7 + $0x1], 0 }
   0x7   :  { %13 = vsyncpa [#allocation5], 0 }
   0x8   :  { %15 = vsyncpa [#allocation5 + $0x1], 0  ;;  %s1756_s9 = smov 0   ;;  %s1758_s10 = smov 0  }
   0x9   :  { %s1760_s11 = smov 0   ;;  %s1762_s12 = smov 0  }
   0xa   :  { %s1764_s13 = smov 0   ;;  %s1766_s14 = smov 0  }
   0xb   :  { %s1768_s15 = smov 0   ;;  %s1770_s16 = smov 0  }
   0xc   :  { %s1772_s17 = smov 0   ;;  %s1774_s18 = smov 0  }
   0xd   :  { %s1776_s19 = smov 0   ;;  %s1778_s20 = smov 0  }
   0xe   :  { %s1780_s21 = smov 0   ;;  %s1782_s22 = smov 0  }
   0xf LB: > { %2222 = sst [smem:[#allocation12_spill]] %s1712_s18  ;;  %s1247_s23 = sadd.s32 4294967295, %s1728_s22   ;;  %s1728_s22 = sphi %s1782_s22, %s21_s22   ;;  %s1724_s21 = sphi %s1780_s21, %s2250_s21   ;;  %s1720_s20 = sphi %s1778_s20, %s2261_s20   ;;  %s1716_s19 = sphi %s1776_s19, %s2248_s19   ;;  %s1712_s18 = sphi %s1774_s18, %s2260_s18   ;;  %s1708_s17 = sphi %s1772_s17, %s2259_s17   ;;  %s1704_s16 = sphi %s1770_s16, %s2258_s16   ;;  %s1700_s15 = sphi %s1768_s15, %s2257_s15   ;;  %s1696_s14 = sphi %s1766_s14, %s2256_s14   ;;  %s1692_s13 = sphi %s1764_s13, %s2255_s13   ;;  %s1688_s12 = sphi %s1762_s12, %s2254_s12   ;;  %s1684_s11 = sphi %s1760_s11, %s2253_s11   ;;  %s1680_s10 = sphi %s1758_s10, %s2252_s10   ;;  %s1676_s9 = sphi %s1756_s9, %s2251_s9  }
  0x10   : > { %2223 = sst [smem:[#allocation13_spill]] %s1724_s21  ;;  %p56_p0 = scmp.ne.s32.totalorder %s1708_s17, %s1704_s16 }
  0x11   : > { %p57_p1 = scmp.eq.s32.totalorder %s1728_s22, 0  ;;  %p62_p2 = scmp.ne.s32.totalorder %s1704_s16, %s1700_s15 }
  0x12   : > { %p1831_p3 = scmp.eq.s32.totalorder %s1247_s23, 0  ;;  %p1835_p4 = scmp.eq.s32.totalorder %s1247_s23, 5 }
  0x13   : > { %p58_p5 = por %p57_p1, %p56_p0  ;;  %p1354_p7 = scmp.lt.s32.totalorder %s1728_s22, 6 }
  0x14   : > { %p1843_p6 = por %p1831_p3, %p62_p2  ;;  %s142_s29 = sand.u32 1, %s1708_s17  }
  0x15   : > { %s1302_s30 = sshll.u32 %s1724_s21, 13  ;;  %s1251_s3 = sshll.u32 %s142_s29, 9 }
  0x16   : > { %s2227_s0 = sld [smem:[#allocation18_spill]]  ;;  %s146_s7 = scalar_lea.vmem [#allocation3], %s1251_s3 }
  0x17   : > { %s156_s8 = sshll.u32 %s146_s7, 4  ;;  %p1855_p8 = pnand %p1354_p7, %p58_p5  ;;  %s157_s8 = int_to_ptr.vmem [resolvable:$true] %s156_s8 }
  0x18   : > { %s143_s23 = scalar_lea.sflag [#allocation4], %s142_s29  ;;  %s1537_s25 = scalar_lea.vmem %s157_s8, 8192 }
  0x19   : > { %p1526_p9 = pneg %p1855_p8  ;;  %p1538_p10 = scmp.ne.s32.totalorder %s157_s8, %s1537_s25 }
  0x1a   : > { %s1730_s24 = smov [#allocation3]  }
  0x1b   : > { %p1540_p11 = pnand %p1538_p10, %p1526_p9  ;;  %s1542_s2 = sshll.u32 %s1730_s24, 4  ;;  %s1543_s2 = int_to_ptr.vmem [resolvable:$false] %s1542_s2 }
  0x1c   : > { %s155_s6 = scalar_lea.hbm %s2227_s0, %s1302_s30  ;;  %s1544_s30 = scalar_lea.vmem %s1543_s2, 16384 }
  0x1d   : > { %p1541_p12 = pneg %p1540_p11  ;;  %p1545_p13 = scmp.lt.s32.totalorder %s157_s8, %s1543_s2 }
  0x1e   : > { %p1546_p0 = scmp.lt.s32.totalorder %s1544_s30, %s1537_s25 }
  0x20   : > { %p1547_p2 = por %p1546_p0, %p1545_p13 }
  0x22   : > { %p1548_p5 = pnand %p1547_p2, %p1541_p12 }
  0x24   : > { %1551 = shalt.err (!%p1548_p5)
}
  0x25   : > { %s1731_s3 = smov 256   ;;  %s1732_s2 = smov 16  }
  0x26   : > { %1346 = dma.hbm_to_vmem [thread:$0]  (!%p1855_p8), %s155_s6, 8192, %s157_s8, %s143_s23, %s1731_s3, %s1731_s3, %s1732_s2  }
  0x27   : > { %p1258_p9 = scmp.ge.s32.totalorder %s1728_s22, 1  ;;  %p188_p10 = scmp.lt.s32.totalorder %s1728_s22, 7 }
  0x28   : > { %s1248_s25 = sadd.s32 4294967294, %s1728_s22   ;;  %s36_s29 = sadd.s32 1, %s1720_s20 }
  0x29   : > { %p1865_p11 = pnand %p1258_p9, %p188_p10  ;;  %s77_s4 = sadd.s32 1, %s1696_s14 }
  0x2a   : > { %p38_p12 = scmp.ge.s32.totalorder %s36_s29, 3  ;;  %p84_p13 = scmp.ne.s32.totalorder %s1696_s14, %s1692_s13 }
  0x2b   : > { %p90_p0 = scmp.ne.s32.totalorder %s1692_s13, %s1688_s12  ;;  %s105_s5 = sadd.s32 1, %s1684_s11 }
  0x2c   : > { %s2263_s29 = smov (%p38_p12, %s36_s29), 0  ;;  %s2231_s6 = sadd.s32 1, %s1724_s21 }
  0x2d   : > { %2230 = sst [smem:[#allocation14_spill]] %s2263_s29  ;;  %s2265_s6 = smov (!%p38_p12, %s2231_s6), %s1724_s21 }
  0x2e   : > { %s73_s7 = ssub.s32 %s1720_s20, %s2263_s29  ;;  %p1886_p8 = por %p84_p13, %p57_p1 }
  0x2f   : > { %p42_p2 = scmp.ge.s32.totalorder %s2265_s6, 2  ;;  %p75_p5 = scmp.eq.s32.totalorder %s73_s7, 0 }
  0x30   : > { %p1892_p9 = por %p90_p0, %p1831_p3  ;;  %p115_p10 = scmp.ne.s32.totalorder %s1684_s11, %s1680_s10 }
  0x31   : > { %s2267_s6 = smov (%p42_p2, %s2265_s6), 0  ;;  %p121_p13 = scmp.ne.s32.totalorder %s1680_s10, %s1676_s9 }
  0x32   : > { %2234 = sst [smem:[#allocation15_spill]] %s2267_s6  ;;  %s44_s23 = ssub.s32 %s1724_s21, %s2267_s6 }
  0x33   : > { %s1901_s15 = scalar_select %p75_p5, %s1696_s14, %s77_s4  }
  0x34   : > { %p1907_p1 = por %p1835_p4, %p115_p10  ;;  %p47_p12 = scmp.eq.s32.totalorder %s44_s23, 0 }
  0x35   : > { %2235 = sst [smem:[#allocation16_spill]] %s1901_s15  ;;  %s102_s26 = sor.u32 %s73_s7, %s44_s23 }
  0x36   : > { %s2236_s30 = scalar_select %p1907_p1, 1, 0 }
  0x37   : > { %p103_p3 = scmp.eq.s32.totalorder %s102_s26, 0  ;;  %s2238_s3 = sadd.s32 1, %s1708_s17 }
  0x38   : > { %2237 = sst [smem:[#allocation17_spill]] %s2236_s30  ;;  %p122_p0 = scmp.eq.s32.totalorder %s1248_s25, 5 }
  0x39   : > { %s1916_s2 = scalar_select %p47_p12, %s1708_s17, %s2238_s3  }
  0x3a   : > { %s1919_s0 = scalar_select %p103_p3, %s1684_s11, %s105_s5  }
  0x3b   : > { %s166_s4 = sand.u32 1, %s1696_s14   ;;  %p1922_p2 = por %p122_p0, %p121_p13 }
  0x3c   : > { %s1255_s29 = sshll.u32 %s166_s4, 8  ;;  %s1303_s6 = sshll.u32 %s1720_s20, 7 }
  0x3d   : > { %s2239_s27 = scalar_select %p1922_p2, 1, 0 }
  0x3e   : > { %s170_s21 = scalar_lea.vmem [#allocation6], %s1255_s29  ;;  %s179_s7 = scalar_lea.hbm %s2211_s1, %s1303_s6 }
  0x3f   : > { %s180_s15 = sshll.u32 %s170_s21, 4  ;;  %p1934_p4 = pnand %p1354_p7, %p1886_p8  ;;  %s181_s15 = int_to_ptr.vmem [resolvable:$true] %s180_s15 }
  0x40   : > { %s167_s25 = scalar_lea.sflag [#allocation7], %s166_s4  ;;  %s1565_s23 = scalar_lea.vmem %s181_s15, 4096 }
  0x41   : > { %p1554_p5 = pneg %p1934_p4  ;;  %p1566_p10 = scmp.ne.s32.totalorder %s181_s15, %s1565_s23 }
  0x42   : > { %s1733_s21 = smov [#allocation6]  }
  0x43   : > { %p1568_p12 = pnand %p1566_p10, %p1554_p5  ;;  %s1570_s29 = sshll.u32 %s1733_s21, 4  ;;  %s1571_s29 = int_to_ptr.vmem [resolvable:$false] %s1570_s29 }
  0x44   : > { %s1572_s18 = scalar_lea.vmem %s1571_s29, 8192  ;;  %p1573_p13 = scmp.lt.s32.totalorder %s181_s15, %s1571_s29 }
  0x45   : > { %p1569_p3 = pneg %p1568_p12  ;;  %p1574_p0 = scmp.lt.s32.totalorder %s1572_s18, %s1565_s23 }
  0x47   : > { %p1575_p2 = por %p1574_p0, %p1573_p13 }
  0x49   : > { %p1576_p1 = pnand %p1575_p2, %p1569_p3 }
  0x4b   : > { %1579 = shalt.err (!%p1576_p1)
}
  0x4c   : > { %s1734_s6 = smov 384   ;;  %s1735_s8 = smov 128  }
  0x4d   : > { %s1736_s30 = smov 8   ;;  %192 = sbr.rel (%p1865_p11) target bundleno = 422 (0x1a6), region = 28 }
  0x4e   : > { %1349 = dma.hbm_to_vmem [thread:$0]  (!%p1934_p4), %s179_s7, 4096, %s181_s15, %s167_s25, %s1734_s6, %s1735_s8, %s1736_s30  }
  0x4f   : > { %s194_s26 = sand.u32 (!%p1865_p11), 1, %s1704_s16  }
  0x50   : > { %s1259_s3 = sshll.u32 (!%p1865_p11), %s194_s26, 9  ;;  %s195_s4 = scalar_lea.sflag (!%p1865_p11), [#allocation4], %s194_s26 }
  0x51   : > { %s1945_s21 = scalar_lea.vmem (!%p1865_p11), [#allocation3], %s1259_s3 }
  0x52   : > { %1663 = dma.done.wait (%p1843_p6), %s195_s4, 8192  }
  0x53   : > { %1665 = vsyncadd (%p1843_p6), %s195_s4, 4294959104  ;;  %s203_s23 = sand.u32 1, %s1692_s13  }
  0x54   : > { %s1260_s5 = sshll.u32 %s203_s23, 8  ;;  %s204_s15 = scalar_lea.sflag [#allocation7], %s203_s23 }
  0x55   : > { %s1952_s7 = scalar_lea.vmem [#allocation6], %s1260_s5 }
  0x56   : > { %1667 = dma.done.wait (%p1892_p9), %s204_s15, 4096  }
  0x57   : > { %1669 = vsyncadd (%p1892_p9), %s204_s15, 4294963200  ;;  %v1476_v0 = vld [vmem:[%s1952_s7 + $0x74] ss:$8 sps:$4 sm:$0xff]   ;;  %v1478_v1 = vld [vmem:[%s1952_s7 + $0x70] ss:$8 sps:$4 sm:$0xff]   ;;  %s230_s28 = sand.u32 1, %s1680_s10  }
  0x58   : > { %659 = vmatprep.subr.bf16.mxu0 %v1476_v0  ;;  %1304 = vmatprep.subr.bf16.mxu1 %v1476_v0  ;;  %v1479_v2 = vld [vmem:[%s1952_s7 + $0x64] ss:$8 sps:$4 sm:$0xff]   ;;  %v1481_v3 = vld [vmem:[%s1952_s7 + $0x60] ss:$8 sps:$4 sm:$0xff]   ;;  %v1482_v4 = vld [vmem:[%s1952_s7 + $0x54] ss:$8 sps:$4 sm:$0xff]  }
  0x59   : > { %660 = vmatpush1.bf16.msra.mxu0 %v1478_v1  ;;  %1320 = vmatpush1.bf16.msra.mxu1 %v1478_v1  ;;  %v1484_v5 = vld [vmem:[%s1952_s7 + $0x50] ss:$8 sps:$4 sm:$0xff]   ;;  %v1485_v6 = vld [vmem:[%s1952_s7 + $0x44] ss:$8 sps:$4 sm:$0xff]   ;;  %v1487_v7 = vld [vmem:[%s1952_s7 + $0x40] ss:$8 sps:$4 sm:$0xff]  }
  0x5a   : > { %661 = vmatprep.subr.bf16.mxu0 %v1479_v2  ;;  %1305 = vmatprep.subr.bf16.mxu1 %v1479_v2  ;;  %v1488_v8 = vld [vmem:[%s1952_s7 + $0x34] ss:$8 sps:$4 sm:$0xff]   ;;  %v1490_v9 = vld [vmem:[%s1952_s7 + $0x30] ss:$8 sps:$4 sm:$0xff]   ;;  %v1491_v10 = vld [vmem:[%s1952_s7 + $0x24] ss:$8 sps:$4 sm:$0xff]  }
  0x5b   : > { %v1493_v11 = vld [vmem:[%s1952_s7 + $0x20] ss:$8 sps:$4 sm:$0xff]   ;;  %v1494_v12 = vld [vmem:[%s1952_s7 + $0x14] ss:$8 sps:$4 sm:$0xff]   ;;  %v1496_v18 = vld [vmem:[%s1952_s7 + $0x10] ss:$8 sps:$4 sm:$0xff]  }
  0x5c   : > { %v372_v13 = vld [vmem:[%s1945_s21 + $0x8] sm:$0xff]  ;;  %v374_v14 = vld [vmem:[%s1945_s21 + $0x18] sm:$0xff]  ;;  %v371_v38 = vld [vmem:[%s1945_s21] sm:$0xff]  ;;  %s1261_s24 = sshll.u32 %s230_s28, 9  ;;  %s2241_s25 = sld [smem:[#allocation12_spill]] }
  0x5d   : > { %662 = vmatpush1.bf16.msra.mxu0 %v1481_v3  ;;  %1321 = vmatpush1.bf16.msra.mxu1 %v1481_v3  ;;  %v436_v15 = vpack.c.bf16 %v374_v14, %v372_v13  ;;  %v404_v16 = vld [vmem:[%s1945_s21 + $0x108] sm:$0xff]  ;;  %v406_v17 = vld [vmem:[%s1945_s21 + $0x118] sm:$0xff]  ;;  %v373_v39 = vld [vmem:[%s1945_s21 + $0x10] sm:$0xff]  ;;  %s2057_s12 = scalar_lea.vmem [#allocation8], %s1261_s24  ;;  %s1336_s29 = smul.u32 192, %s1716_s19 }
  0x5e   : > { %663 = vmatprep.subr.bf16.mxu0 %v1482_v4  ;;  %1306 = vmatprep.subr.bf16.mxu1 %v1482_v4  ;;  %v452_v19 = vpack.c.bf16 %v406_v17, %v404_v16  ;;  %v1497_v20 = vld [vmem:[%s1952_s7 + $0x4] ss:$8 sps:$4 sm:$0xff]   ;;  %v1499_v21 = vld [vmem:[%s1952_s7] ss:$8 sps:$4 sm:$0xff]   ;;  %v1500_v22 = vld [vmem:[%s1952_s7 + $0xf4] ss:$8 sps:$4 sm:$0xff]   ;;  %v435_v46 = vpack.c.bf16 %v373_v39, %v371_v38 }
  0x5f   : > { %691 = vmatprep.mubr.bf16.mxu0 %v436_v15  ;;  %v1502_v23 = vld [vmem:[%s1952_s7 + $0xf0] ss:$8 sps:$4 sm:$0xff]   ;;  %v1503_v24 = vld [vmem:[%s1952_s7 + $0xe4] ss:$8 sps:$4 sm:$0xff]   ;;  %v1505_v25 = vld [vmem:[%s1952_s7 + $0xe0] ss:$8 sps:$4 sm:$0xff]  }
  0x60   : > { %771 = vmatprep.mubr.bf16.mxu1 %v452_v19  ;;  %v1506_v26 = vld [vmem:[%s1952_s7 + $0xd4] ss:$8 sps:$4 sm:$0xff]   ;;  %v1508_v27 = vld [vmem:[%s1952_s7 + $0xd0] ss:$8 sps:$4 sm:$0xff]   ;;  %v1509_v28 = vld [vmem:[%s1952_s7 + $0xc4] ss:$8 sps:$4 sm:$0xff]  }
  0x61   : > { %664 = vmatpush1.bf16.msra.mxu0 %v1484_v5  ;;  %1322 = vmatpush1.bf16.msra.mxu1 %v1484_v5  ;;  %v1511_v29 = vld [vmem:[%s1952_s7 + $0xc0] ss:$8 sps:$4 sm:$0xff]   ;;  %v1512_v30 = vld [vmem:[%s1952_s7 + $0xb4] ss:$8 sps:$4 sm:$0xff]   ;;  %v1514_v31 = vld [vmem:[%s1952_s7 + $0xb0] ss:$8 sps:$4 sm:$0xff]  }
  0x62   : > { %665 = vmatprep.subr.bf16.mxu0 %v1485_v6  ;;  %1307 = vmatprep.subr.bf16.mxu1 %v1485_v6  ;;  %v1515_v32 = vld [vmem:[%s1952_s7 + $0xa4] ss:$8 sps:$4 sm:$0xff]   ;;  %v1517_v33 = vld [vmem:[%s1952_s7 + $0xa0] ss:$8 sps:$4 sm:$0xff]   ;;  %v1518_v34 = vld [vmem:[%s1952_s7 + $0x94] ss:$8 sps:$4 sm:$0xff]  }
  0x63   : > { %v1520_v35 = vld [vmem:[%s1952_s7 + $0x90] ss:$8 sps:$4 sm:$0xff]   ;;  %v1521_v36 = vld [vmem:[%s1952_s7 + $0x84] ss:$8 sps:$4 sm:$0xff]   ;;  %v1523_v37 = vld [vmem:[%s1952_s7 + $0x80] ss:$8 sps:$4 sm:$0xff]  }
  0x64   : > { %v403_v40 = vld [vmem:[%s1945_s21 + $0x100] sm:$0xff]  ;;  %v405_v41 = vld [vmem:[%s1945_s21 + $0x110] sm:$0xff]  ;;  %v376_v42 = vld [vmem:[%s1945_s21 + $0x28] sm:$0xff]  ;;  %s1296_s18 = sshll.u32 %s2241_s25, 1  ;;  %s1128_s8 = sshll.u32 %s2057_s12, 4  ;;  %s2127_s8 = int_to_ptr.vmem [resolvable:$true] %s1128_s8 }
  0x65   : > { %666 = vmatpush1.bf16.msra.mxu0 %v1487_v7  ;;  %1323 = vmatpush1.bf16.msra.mxu1 %v1487_v7  ;;  %v378_v43 = vld [vmem:[%s1945_s21 + $0x38] sm:$0xff]  ;;  %v408_v44 = vld [vmem:[%s1945_s21 + $0x128] sm:$0xff]  ;;  %v451_v47 = vpack.c.bf16 %v405_v41, %v403_v40  ;;  %v375_v50 = vld [vmem:[%s1945_s21 + $0x20] sm:$0xff]  ;;  %s1125_s6 = sadd.s32 %s1336_s29, %s1296_s18  ;;  %s2242_s30 = sld [smem:[#allocation17_spill]] }
  0x66   : > { %667 = vmatprep.subr.bf16.mxu0 %v1488_v8  ;;  %1308 = vmatprep.subr.bf16.mxu1 %v1488_v8  ;;  %v410_v45 = vld [vmem:[%s1945_s21 + $0x138] sm:$0xff]  ;;  %v438_v48 = vpack.c.bf16 %v378_v43, %v376_v42  ;;  %v377_v51 = vld [vmem:[%s1945_s21 + $0x30] sm:$0xff]  ;;  %v407_v52 = vld [vmem:[%s1945_s21 + $0x120] sm:$0xff]  ;;  %s1298_s19 = sshll.u32 %s1125_s6, 7  ;;  %s2243_s4 = sld [smem:[#allocation19_spill]] }
  0x67   : > { %v454_v49 = vpack.c.bf16 %v410_v45, %v408_v44  ;;  %v409_v53 = vld [vmem:[%s1945_s21 + $0x130] sm:$0xff]  ;;  %v380_v54 = vld [vmem:[%s1945_s21 + $0x48] sm:$0xff]  ;;  %v382_v55 = vld [vmem:[%s1945_s21 + $0x58] sm:$0xff]  ;;  %v437_v58 = vpack.c.bf16 %v377_v51, %v375_v50  ;;  %s2135_s23 = scalar_lea.sflag [#allocation5], %s230_s28  ;;  %s1580_s5 = scalar_lea.vmem %s2127_s8, 8192 }
  0x68   : > { %v412_v56 = vld [vmem:[%s1945_s21 + $0x148] sm:$0xff]  ;;  %v414_v57 = vld [vmem:[%s1945_s21 + $0x158] sm:$0xff]  ;;  %v453_v59 = vpack.c.bf16 %v409_v53, %v407_v52  ;;  %v440_v60 = vpack.c.bf16 %v382_v55, %v380_v54  ;;  %v379_v62 = vld [vmem:[%s1945_s21 + $0x40] sm:$0xff]  ;;  %p1581_p6 = scmp.ne.s32.totalorder %s2127_s8, %s1580_s5  ;;  %s1737_s15 = smov [#allocation8]  }
  0x69   : > { %668 = vmatpush1.bf16.msra.mxu0 %v1490_v9  ;;  %1324 = vmatpush1.bf16.msra.mxu1 %v1490_v9  ;;  %v456_v61 = vpack.c.bf16 %v414_v57, %v412_v56  ;;  %v381_v63 = vld [vmem:[%s1945_s21 + $0x50] sm:$0xff]  ;;  %v411_v0 = vld [vmem:[%s1945_s21 + $0x140] sm:$0xff]  ;;  %v384_v2 = vld [vmem:[%s1945_s21 + $0x68] sm:$0xff]  ;;  %s1584_s7 = sshll.u32 %s1737_s15, 4  ;;  %s1585_s7 = int_to_ptr.vmem [resolvable:$false] %s1584_s7 }
  0x6a   : > { %669 = vmatprep.subr.bf16.mxu0 %v1491_v10  ;;  %1309 = vmatprep.subr.bf16.mxu1 %v1491_v10  ;;  %v413_v1 = vld [vmem:[%s1945_s21 + $0x150] sm:$0xff]  ;;  %v386_v3 = vld [vmem:[%s1945_s21 + $0x78] sm:$0xff]  ;;  %v416_v4 = vld [vmem:[%s1945_s21 + $0x168] sm:$0xff]  ;;  %v439_v6 = vpack.c.bf16 %v381_v63, %v379_v62  ;;  %s1586_s24 = scalar_lea.vmem %s1585_s7, 16384  ;;  %p1587_p9 = scmp.lt.s32.totalorder %s2127_s8, %s1585_s7 }
  0x6b   : > { %v418_v5 = vld [vmem:[%s1945_s21 + $0x178] sm:$0xff]  ;;  %v455_v7 = vpack.c.bf16 %v413_v1, %v411_v0  ;;  %v442_v8 = vpack.c.bf16 %v386_v3, %v384_v2  ;;  %v383_v10 = vld [vmem:[%s1945_s21 + $0x60] sm:$0xff]  ;;  %v417_v13 = vld [vmem:[%s1945_s21 + $0x170] sm:$0xff]  ;;  %p2244_p7 = scmp.ne.s32.totalorder %s2242_s30, 0  ;;  %p1588_p1 = scmp.lt.s32.totalorder %s1586_s24, %s1580_s5 }
  0x6c   : > { %v458_v9 = vpack.c.bf16 %v418_v5, %v416_v4  ;;  %v388_v14 = vld [vmem:[%s1945_s21 + $0x88] sm:$0xff]  ;;  %v390_v15 = vld [vmem:[%s1945_s21 + $0x98] sm:$0xff] }
  0x6d   : > { %670 = vmatpush1.bf16.msra.mxu0 %v1493_v11  ;;  %1325 = vmatpush1.bf16.msra.mxu1 %v1493_v11  ;;  %v385_v11 = vld [vmem:[%s1945_s21 + $0x70] sm:$0xff]  ;;  %v420_v16 = vld [vmem:[%s1945_s21 + $0x188] sm:$0xff]  ;;  %v422_v17 = vld [vmem:[%s1945_s21 + $0x198] sm:$0xff]  ;;  %p1582_p11 = pnand %p1581_p6, %p2244_p7  ;;  %p1589_p2 = por %p1588_p1, %p1587_p9 }
  0x6e   : > { %671 = vmatprep.subr.bf16.mxu0 %v1494_v12  ;;  %1310 = vmatprep.subr.bf16.mxu1 %v1494_v12  ;;  %v415_v12 = vld [vmem:[%s1945_s21 + $0x160] sm:$0xff]  ;;  %v396_v38 = vld [vmem:[%s1945_s21 + $0xc8] sm:$0xff]  ;;  %v398_v39 = vld [vmem:[%s1945_s21 + $0xd8] sm:$0xff] }
  0x6f   : > { %v457_v19 = vpack.c.bf16 %v417_v13, %v415_v12  ;;  %v428_v40 = vld [vmem:[%s1945_s21 + $0x1c8] sm:$0xff]  ;;  %v430_v41 = vld [vmem:[%s1945_s21 + $0x1d8] sm:$0xff]  ;;  %v448_v44 = vpack.c.bf16 %v398_v39, %v396_v38  ;;  %p1583_p8 = pneg %p1582_p11 }
  0x70   : > { %v464_v45 = vpack.c.bf16 %v430_v41, %v428_v40  ;;  %v400_v50 = vld [vmem:[%s1945_s21 + $0xe8] sm:$0xff]  ;;  %v402_v51 = vld [vmem:[%s1945_s21 + $0xf8] sm:$0xff] }
  0x71   : > { %672 = vmatpush1.bf16.msra.mxu0 %v1496_v18  ;;  %1326 = vmatpush1.bf16.msra.mxu1 %v1496_v18  ;;  %v441_v18 = vpack.c.bf16 %v385_v11, %v383_v10  ;;  %v432_v52 = vld [vmem:[%s1945_s21 + $0x1e8] sm:$0xff]  ;;  %v434_v53 = vld [vmem:[%s1945_s21 + $0x1f8] sm:$0xff]  ;;  %v450_v56 = vpack.c.bf16 %v402_v51, %v400_v50  ;;  %p1590_p4 = pnand %p1589_p2, %p1583_p8 }
  0x72   : > { %673 = vmatprep.subr.bf16.mxu0 %v1497_v20  ;;  %1311 = vmatprep.subr.bf16.mxu1 %v1497_v20  ;;  %v444_v20 = vpack.c.bf16 %v390_v15, %v388_v14  ;;  %v466_v57 = vpack.c.bf16 %v434_v53, %v432_v52 }
  0x75   : > { %674 = vmatpush1.bf16.msra.mxu0 %v1499_v21  ;;  %1327 = vmatpush1.bf16.msra.mxu1 %v1499_v21  ;;  %v460_v21 = vpack.c.bf16 %v422_v17, %v420_v16 }
  0x76   : > { %675 = vmatprep.subr.bf16.mxu0 %v1500_v22  ;;  %1312 = vmatprep.subr.bf16.mxu1 %v1500_v22  ;;  %v387_v22 = vld [vmem:[%s1945_s21 + $0x80] sm:$0xff] }
  0x79   : > { %676 = vmatpush2.bf16.msra.mxu0 %v1502_v23  ;;  %1328 = vmatpush2.bf16.msra.mxu1 %v1502_v23  ;;  %v389_v23 = vld [vmem:[%s1945_s21 + $0x90] sm:$0xff] }
  0x7a   : > { %677 = vmatprep.subr.bf16.mxu0 %v1503_v24  ;;  %1313 = vmatprep.subr.bf16.mxu1 %v1503_v24  ;;  %v419_v24 = vld [vmem:[%s1945_s21 + $0x180] sm:$0xff] }
  0x7d   : > { %678 = vmatpush2.bf16.msra.mxu0 %v1505_v25  ;;  %1329 = vmatpush2.bf16.msra.mxu1 %v1505_v25  ;;  %v421_v25 = vld [vmem:[%s1945_s21 + $0x190] sm:$0xff] }
  0x7e   : > { %679 = vmatprep.subr.bf16.mxu0 %v1506_v26  ;;  %1314 = vmatprep.subr.bf16.mxu1 %v1506_v26  ;;  %v392_v26 = vld [vmem:[%s1945_s21 + $0xa8] sm:$0xff] }
  0x81   : > { %680 = vmatpush2.bf16.msra.mxu0 %v1508_v27  ;;  %1330 = vmatpush2.bf16.msra.mxu1 %v1508_v27  ;;  %v394_v27 = vld [vmem:[%s1945_s21 + $0xb8] sm:$0xff] }
  0x82   : > { %681 = vmatprep.subr.bf16.mxu0 %v1509_v28  ;;  %1315 = vmatprep.subr.bf16.mxu1 %v1509_v28  ;;  %v424_v28 = vld [vmem:[%s1945_s21 + $0x1a8] sm:$0xff] }
  0x85   : > { %682 = vmatpush2.bf16.msra.mxu0 %v1511_v29  ;;  %1331 = vmatpush2.bf16.msra.mxu1 %v1511_v29  ;;  %v426_v29 = vld [vmem:[%s1945_s21 + $0x1b8] sm:$0xff] }
  0x86   : > { %683 = vmatprep.subr.bf16.mxu0 %v1512_v30  ;;  %1316 = vmatprep.subr.bf16.mxu1 %v1512_v30  ;;  %v443_v30 = vpack.c.bf16 %v389_v23, %v387_v22 }
  0x89   : > { %684 = vmatpush2.bf16.msra.mxu0 %v1514_v31  ;;  %1332 = vmatpush2.bf16.msra.mxu1 %v1514_v31  ;;  %v459_v31 = vpack.c.bf16 %v421_v25, %v419_v24 }
  0x8a   : > { %685 = vmatprep.subr.bf16.mxu0 %v1515_v32  ;;  %1317 = vmatprep.subr.bf16.mxu1 %v1515_v32  ;;  %v446_v32 = vpack.c.bf16 %v394_v27, %v392_v26 }
  0x8d   : > { %686 = vmatpush2.bf16.msra.mxu0 %v1517_v33  ;;  %1333 = vmatpush2.bf16.msra.mxu1 %v1517_v33  ;;  %v462_v33 = vpack.c.bf16 %v426_v29, %v424_v28 }
  0x8e   : > { %687 = vmatprep.subr.bf16.mxu0 %v1518_v34  ;;  %1318 = vmatprep.subr.bf16.mxu1 %v1518_v34  ;;  %v391_v34 = vld [vmem:[%s1945_s21 + $0xa0] sm:$0xff] }
  0x91   : > { %688 = vmatpush2.bf16.msra.mxu0 %v1520_v35  ;;  %1334 = vmatpush2.bf16.msra.mxu1 %v1520_v35  ;;  %v393_v35 = vld [vmem:[%s1945_s21 + $0xb0] sm:$0xff] }
  0x92   : > { %689 = vmatprep.subr.bf16.mxu0 %v1521_v36  ;;  %1319 = vmatprep.subr.bf16.mxu1 %v1521_v36  ;;  %v423_v36 = vld [vmem:[%s1945_s21 + $0x1a0] sm:$0xff]  ;;  %v445_v42 = vpack.c.bf16 %v393_v35, %v391_v34 }
  0x95   : > { %690 = vmatpush2.bf16.msra.mxu0 %v1523_v37  ;;  %1335 = vmatpush2.bf16.msra.mxu1 %v1523_v37  ;;  %v425_v37 = vld [vmem:[%s1945_s21 + $0x1b0] sm:$0xff] }
  0x96   : > { %v461_v43 = vpack.c.bf16 %v425_v37, %v423_v36 }
  0x98   : > { %692 = vmatmul.mubr.bf16.vlgmr.msra.gmra.mxu0 %v435_v46  ;;  %772 = vmatmul.mubr.bf16.vlgmr.msra.gmra.mxu1 %v451_v47  ;;  %v395_v46 = vld [vmem:[%s1945_s21 + $0xc0] sm:$0xff]  ;;  %v397_v47 = vld [vmem:[%s1945_s21 + $0xd0] sm:$0xff] }
  0x99   : > { %701 = vmatprep.mubr.bf16.mxu0 %v438_v48  ;;  %781 = vmatprep.mubr.bf16.mxu1 %v454_v49  ;;  %v427_v48 = vld [vmem:[%s1945_s21 + $0x1c0] sm:$0xff]  ;;  %v429_v49 = vld [vmem:[%s1945_s21 + $0x1d0] sm:$0xff]  ;;  %v447_v54 = vpack.c.bf16 %v397_v47, %v395_v46 }
  0x9a   : > { %v463_v55 = vpack.c.bf16 %v429_v49, %v427_v48 }
  0xa0   : > { %702 = vmatmul.mubr.bf16.gmra.mxu0 %v437_v58  ;;  %782 = vmatmul.mubr.bf16.gmra.mxu1 %v453_v59  ;;  %v399_v58 = vld [vmem:[%s1945_s21 + $0xe0] sm:$0xff]  ;;  %v401_v59 = vld [vmem:[%s1945_s21 + $0xf0] sm:$0xff] }
  0xa1   : > { %711 = vmatprep.mubr.bf16.mxu0 %v440_v60  ;;  %791 = vmatprep.mubr.bf16.mxu1 %v456_v61  ;;  %v431_v60 = vld [vmem:[%s1945_s21 + $0x1e0] sm:$0xff]  ;;  %v433_v61 = vld [vmem:[%s1945_s21 + $0x1f0] sm:$0xff]  ;;  %v449_v62 = vpack.c.bf16 %v401_v59, %v399_v58  ;;  %s2125_s21 = scalar_lea.hbm %s2243_s4, %s1298_s19 }
  0xa2   : > { %v465_v63 = vpack.c.bf16 %v433_v61, %v431_v60 }
  0xa8   : > { %712 = vmatmul.mubr.bf16.gmra.mxu0 %v439_v6  ;;  %792 = vmatmul.mubr.bf16.gmra.mxu1 %v455_v7 }
  0xa9   : > { %721 = vmatprep.mubr.bf16.mxu0 %v442_v8  ;;  %801 = vmatprep.mubr.bf16.mxu1 %v458_v9 }
  0xb0   : > { %722 = vmatmul.mubr.bf16.gmra.mxu0 %v441_v18  ;;  %802 = vmatmul.mubr.bf16.gmra.mxu1 %v457_v19 }
  0xb1   : > { %731 = vmatprep.mubr.bf16.mxu0 %v444_v20  ;;  %811 = vmatprep.mubr.bf16.mxu1 %v460_v21 }
  0xb8   : > { %732 = vmatmul.mubr.bf16.gmra.mxu0 %v443_v30  ;;  %812 = vmatmul.mubr.bf16.gmra.mxu1 %v459_v31 }
  0xb9   : > { %741 = vmatprep.mubr.bf16.mxu0 %v446_v32  ;;  %821 = vmatprep.mubr.bf16.mxu1 %v462_v33 }
  0xc0   : > { %742 = vmatmul.mubr.bf16.gmra.mxu0 %v445_v42  ;;  %822 = vmatmul.mubr.bf16.gmra.mxu1 %v461_v43 }
  0xc1   : > { %751 = vmatprep.mubr.bf16.mxu0 %v448_v44  ;;  %831 = vmatprep.mubr.bf16.mxu1 %v464_v45 }
  0xc8   : > { %752 = vmatmul.mubr.bf16.gmra.mxu0 %v447_v54  ;;  %832 = vmatmul.mubr.bf16.gmra.mxu1 %v463_v55 }
  0xc9   : > { %761 = vmatprep.mubr.bf16.mxu0 %v450_v56  ;;  %841 = vmatprep.mubr.bf16.mxu1 %v466_v57 }
  0xd0   : > { %762 = vmatmul.mubr.bf16.gmra.mxu0 %v449_v62  ;;  %842 = vmatmul.mubr.bf16.gmra.mxu1 %v465_v63 }
 0x158   : > { %v693_v0 = vpop.f32.mrf.mxu0  ;;  %v773_v1 = vpop.f32.mrf.mxu1 }
 0x159   : > { %1047 = vst [vmem:[%s2057_s12] sm:$0xff] %v693_v0  ;;  %1079 = vst [vmem:[%s2057_s12 + $0x100] sm:$0xff] %v773_v1 }
 0x15a   : > { %v695_v2 = vpop.f32.mrf.mxu0  ;;  %v775_v3 = vpop.f32.mrf.mxu1 }
 0x15b   : > { %1048 = vst [vmem:[%s2057_s12 + $0x8] sm:$0xff] %v695_v2  ;;  %1080 = vst [vmem:[%s2057_s12 + $0x108] sm:$0xff] %v775_v3 }
 0x15c   : > { %v697_v4 = vpop.f32.mrf.mxu0  ;;  %v777_v5 = vpop.f32.mrf.mxu1 }
 0x15d   : > { %1049 = vst [vmem:[%s2057_s12 + $0x10] sm:$0xff] %v697_v4  ;;  %1081 = vst [vmem:[%s2057_s12 + $0x110] sm:$0xff] %v777_v5 }
 0x15e   : > { %v699_v6 = vpop.f32.mrf.mxu0  ;;  %v779_v7 = vpop.f32.mrf.mxu1 }
 0x15f   : > { %1050 = vst [vmem:[%s2057_s12 + $0x18] sm:$0xff] %v699_v6  ;;  %1082 = vst [vmem:[%s2057_s12 + $0x118] sm:$0xff] %v779_v7 }
 0x160   : > { %v703_v8 = vpop.f32.mrf.mxu0  ;;  %v783_v9 = vpop.f32.mrf.mxu1 }
 0x161   : > { %1051 = vst [vmem:[%s2057_s12 + $0x20] sm:$0xff] %v703_v8  ;;  %1083 = vst [vmem:[%s2057_s12 + $0x120] sm:$0xff] %v783_v9 }
 0x162   : > { %v705_v10 = vpop.f32.mrf.mxu0  ;;  %v785_v11 = vpop.f32.mrf.mxu1 }
 0x163   : > { %1052 = vst [vmem:[%s2057_s12 + $0x28] sm:$0xff] %v705_v10  ;;  %1084 = vst [vmem:[%s2057_s12 + $0x128] sm:$0xff] %v785_v11 }
 0x164   : > { %v707_v12 = vpop.f32.mrf.mxu0  ;;  %v787_v13 = vpop.f32.mrf.mxu1 }
 0x165   : > { %1053 = vst [vmem:[%s2057_s12 + $0x30] sm:$0xff] %v707_v12  ;;  %1085 = vst [vmem:[%s2057_s12 + $0x130] sm:$0xff] %v787_v13 }
 0x166   : > { %v709_v14 = vpop.f32.mrf.mxu0  ;;  %v789_v15 = vpop.f32.mrf.mxu1 }
 0x167   : > { %1054 = vst [vmem:[%s2057_s12 + $0x38] sm:$0xff] %v709_v14  ;;  %1086 = vst [vmem:[%s2057_s12 + $0x138] sm:$0xff] %v789_v15 }
 0x168   : > { %v713_v16 = vpop.f32.mrf.mxu0  ;;  %v793_v17 = vpop.f32.mrf.mxu1 }
 0x169   : > { %1055 = vst [vmem:[%s2057_s12 + $0x40] sm:$0xff] %v713_v16  ;;  %1087 = vst [vmem:[%s2057_s12 + $0x140] sm:$0xff] %v793_v17 }
 0x16a   : > { %v715_v18 = vpop.f32.mrf.mxu0  ;;  %v795_v19 = vpop.f32.mrf.mxu1 }
 0x16b   : > { %1056 = vst [vmem:[%s2057_s12 + $0x48] sm:$0xff] %v715_v18  ;;  %1088 = vst [vmem:[%s2057_s12 + $0x148] sm:$0xff] %v795_v19 }
 0x16c   : > { %v717_v20 = vpop.f32.mrf.mxu0  ;;  %v797_v21 = vpop.f32.mrf.mxu1 }
 0x16d   : > { %1057 = vst [vmem:[%s2057_s12 + $0x50] sm:$0xff] %v717_v20  ;;  %1089 = vst [vmem:[%s2057_s12 + $0x150] sm:$0xff] %v797_v21 }
 0x16e   : > { %v719_v22 = vpop.f32.mrf.mxu0  ;;  %v799_v23 = vpop.f32.mrf.mxu1 }
 0x16f   : > { %1058 = vst [vmem:[%s2057_s12 + $0x58] sm:$0xff] %v719_v22  ;;  %1090 = vst [vmem:[%s2057_s12 + $0x158] sm:$0xff] %v799_v23 }
 0x170   : > { %v723_v24 = vpop.f32.mrf.mxu0  ;;  %v803_v25 = vpop.f32.mrf.mxu1 }
 0x171   : > { %1059 = vst [vmem:[%s2057_s12 + $0x60] sm:$0xff] %v723_v24  ;;  %1091 = vst [vmem:[%s2057_s12 + $0x160] sm:$0xff] %v803_v25 }
 0x172   : > { %v725_v26 = vpop.f32.mrf.mxu0  ;;  %v805_v27 = vpop.f32.mrf.mxu1 }
 0x173   : > { %1060 = vst [vmem:[%s2057_s12 + $0x68] sm:$0xff] %v725_v26  ;;  %1092 = vst [vmem:[%s2057_s12 + $0x168] sm:$0xff] %v805_v27 }
 0x174   : > { %v727_v28 = vpop.f32.mrf.mxu0  ;;  %v807_v29 = vpop.f32.mrf.mxu1 }
 0x175   : > { %1061 = vst [vmem:[%s2057_s12 + $0x70] sm:$0xff] %v727_v28  ;;  %1093 = vst [vmem:[%s2057_s12 + $0x170] sm:$0xff] %v807_v29 }
 0x176   : > { %v729_v30 = vpop.f32.mrf.mxu0  ;;  %v809_v31 = vpop.f32.mrf.mxu1 }
 0x177   : > { %1062 = vst [vmem:[%s2057_s12 + $0x78] sm:$0xff] %v729_v30  ;;  %1094 = vst [vmem:[%s2057_s12 + $0x178] sm:$0xff] %v809_v31 }
 0x178   : > { %v733_v32 = vpop.f32.mrf.mxu0  ;;  %v813_v33 = vpop.f32.mrf.mxu1 }
 0x179   : > { %1063 = vst [vmem:[%s2057_s12 + $0x80] sm:$0xff] %v733_v32  ;;  %1095 = vst [vmem:[%s2057_s12 + $0x180] sm:$0xff] %v813_v33 }
 0x17a   : > { %v735_v34 = vpop.f32.mrf.mxu0  ;;  %v815_v35 = vpop.f32.mrf.mxu1 }
 0x17b   : > { %1064 = vst [vmem:[%s2057_s12 + $0x88] sm:$0xff] %v735_v34  ;;  %1096 = vst [vmem:[%s2057_s12 + $0x188] sm:$0xff] %v815_v35 }
 0x17c   : > { %v737_v36 = vpop.f32.mrf.mxu0  ;;  %v817_v37 = vpop.f32.mrf.mxu1 }
 0x17d   : > { %1065 = vst [vmem:[%s2057_s12 + $0x90] sm:$0xff] %v737_v36  ;;  %1097 = vst [vmem:[%s2057_s12 + $0x190] sm:$0xff] %v817_v37 }
 0x17e   : > { %v739_v38 = vpop.f32.mrf.mxu0  ;;  %v819_v39 = vpop.f32.mrf.mxu1 }
 0x17f   : > { %1066 = vst [vmem:[%s2057_s12 + $0x98] sm:$0xff] %v739_v38  ;;  %1098 = vst [vmem:[%s2057_s12 + $0x198] sm:$0xff] %v819_v39 }
 0x180   : > { %v743_v40 = vpop.f32.mrf.mxu0  ;;  %v823_v41 = vpop.f32.mrf.mxu1 }
 0x181   : > { %1067 = vst [vmem:[%s2057_s12 + $0xa0] sm:$0xff] %v743_v40  ;;  %1099 = vst [vmem:[%s2057_s12 + $0x1a0] sm:$0xff] %v823_v41 }
 0x182   : > { %v745_v42 = vpop.f32.mrf.mxu0  ;;  %v825_v43 = vpop.f32.mrf.mxu1 }
 0x183   : > { %1068 = vst [vmem:[%s2057_s12 + $0xa8] sm:$0xff] %v745_v42  ;;  %1100 = vst [vmem:[%s2057_s12 + $0x1a8] sm:$0xff] %v825_v43 }
 0x184   : > { %v747_v44 = vpop.f32.mrf.mxu0  ;;  %v827_v45 = vpop.f32.mrf.mxu1 }
 0x185   : > { %1069 = vst [vmem:[%s2057_s12 + $0xb0] sm:$0xff] %v747_v44  ;;  %1101 = vst [vmem:[%s2057_s12 + $0x1b0] sm:$0xff] %v827_v45 }
 0x186   : > { %v749_v46 = vpop.f32.mrf.mxu0  ;;  %v829_v47 = vpop.f32.mrf.mxu1 }
 0x187   : > { %1070 = vst [vmem:[%s2057_s12 + $0xb8] sm:$0xff] %v749_v46  ;;  %1102 = vst [vmem:[%s2057_s12 + $0x1b8] sm:$0xff] %v829_v47 }
 0x188   : > { %v753_v48 = vpop.f32.mrf.mxu0  ;;  %v833_v49 = vpop.f32.mrf.mxu1 }
 0x189   : > { %1071 = vst [vmem:[%s2057_s12 + $0xc0] sm:$0xff] %v753_v48  ;;  %1103 = vst [vmem:[%s2057_s12 + $0x1c0] sm:$0xff] %v833_v49 }
 0x18a   : > { %v755_v50 = vpop.f32.mrf.mxu0  ;;  %v835_v51 = vpop.f32.mrf.mxu1 }
 0x18b   : > { %1072 = vst [vmem:[%s2057_s12 + $0xc8] sm:$0xff] %v755_v50  ;;  %1104 = vst [vmem:[%s2057_s12 + $0x1c8] sm:$0xff] %v835_v51 }
 0x18c   : > { %v757_v52 = vpop.f32.mrf.mxu0  ;;  %v837_v53 = vpop.f32.mrf.mxu1 }
 0x18d   : > { %1073 = vst [vmem:[%s2057_s12 + $0xd0] sm:$0xff] %v757_v52  ;;  %1105 = vst [vmem:[%s2057_s12 + $0x1d0] sm:$0xff] %v837_v53 }
 0x18e   : > { %v759_v54 = vpop.f32.mrf.mxu0  ;;  %v839_v55 = vpop.f32.mrf.mxu1 }
 0x18f   : > { %1074 = vst [vmem:[%s2057_s12 + $0xd8] sm:$0xff] %v759_v54  ;;  %1106 = vst [vmem:[%s2057_s12 + $0x1d8] sm:$0xff] %v839_v55 }
 0x190   : > { %v763_v56 = vpop.f32.mrf.mxu0  ;;  %v843_v57 = vpop.f32.mrf.mxu1 }
 0x191   : > { %1075 = vst [vmem:[%s2057_s12 + $0xe0] sm:$0xff] %v763_v56  ;;  %1107 = vst [vmem:[%s2057_s12 + $0x1e0] sm:$0xff] %v843_v57 }
 0x192   : > { %v765_v58 = vpop.f32.mrf.mxu0  ;;  %v845_v59 = vpop.f32.mrf.mxu1 }
 0x193   : > { %1076 = vst [vmem:[%s2057_s12 + $0xe8] sm:$0xff] %v765_v58  ;;  %1108 = vst [vmem:[%s2057_s12 + $0x1e8] sm:$0xff] %v845_v59 }
 0x194   : > { %v767_v60 = vpop.f32.mrf.mxu0  ;;  %v847_v61 = vpop.f32.mrf.mxu1 }
 0x195   : > { %1077 = vst [vmem:[%s2057_s12 + $0xf0] sm:$0xff] %v767_v60  ;;  %1109 = vst [vmem:[%s2057_s12 + $0x1f0] sm:$0xff] %v847_v61 }
 0x196   : > { %v769_v62 = vpop.f32.mrf.mxu0  ;;  %v849_v63 = vpop.f32.mrf.mxu1 }
 0x197   : > { %1078 = vst [vmem:[%s2057_s12 + $0xf8] sm:$0xff] %v769_v62  ;;  %1110 = vst [vmem:[%s2057_s12 + $0x1f8] sm:$0xff] %v849_v63 }
 0x198   : > { %1593 = shalt.err (!%p1590_p4)
}
 0x199   : > { %s1594_s28 = scalar_lea.hbm %s2125_s21, 8192  ;;  %s1598_s29 = scalar_lea.hbm %s2243_s4, 49152 }
 0x19a   : > { %p1595_p5 = scmp.ne.s32.totalorder %s2125_s21, %s1594_s28  ;;  %p1599_p3 = scmp.lt.s32.totalorder %s2125_s21, %s2243_s4 }
 0x19b   : > { %p1600_p13 = scmp.lt.s32.totalorder %s1598_s29, %s1594_s28 }
 0x19c   : > { %p1596_p10 = pnand %p1595_p5, %p2244_p7 }
 0x19d   : > { %p1601_p0 = por %p1600_p13, %p1599_p3 }
 0x19e   : > { %p1597_p12 = pneg %p1596_p10 }
 0x1a0   : > { %p1602_p6 = pnand %p1601_p0, %p1597_p12 }
 0x1a2   : > { %1605 = shalt.err (!%p1602_p6)
}
 0x1a3   : > { %s1738_s19 = smov 256   ;;  %s1739_s26 = smov 768  }
 0x1a4   : > { %s1740_s3 = smov 16  }
 0x1a5   : > { %1341 = dma.vmem_to_hbm [thread:$0]  (%p2244_p7), %s2127_s8, 8192, %s2125_s21, %s2135_s23, %s1738_s19, %s1739_s26, %s1740_s3  }
 0x1a6 PF: > { %p1355_p11 = scmp.ge.s32.totalorder %s1728_s22, 2  ;;  %s1143_s5 = sand.u32 1, %s1676_s9  }
 0x1a7   : > { %p2245_p8 = scmp.ne.s32.totalorder %s2239_s27, 0  ;;  %s1144_s15 = scalar_lea.sflag [#allocation5], %s1143_s5 }
 0x1a9   : > { %p1351_p9 = pnand %p1355_p11, %p2245_p8 }
 0x1ab   : > { %p1352_p1 = pneg %p1351_p9 }
 0x1ad   : > { %1671 = dma.done.wait (%p1352_p1), %s1144_s15, 8192  }
 0x1ae   : > { %1673 = vsyncadd (%p1352_p1), %s1144_s15, 4294959104  ;;  %s21_s22 = sadd.s32 1, %s1728_s22   ;;  %s2247_s8 = sld [smem:[#allocation16_spill]] }
 0x1af   : > { %p2163_p2 = scmp.ge.s32.totalorder %s21_s22, 8   ;;  %s2248_s19 = sld [smem:[#allocation13_spill]] }
 0x1b0   : > { %s2249_s27 = sld [smem:[#allocation14_spill]]  ;;  %s2251_s9 = smov %s1680_s10 }
 0x1b1   : > { %s2250_s21 = sld [smem:[#allocation15_spill]]  ;;  %s2252_s10 = smov %s1684_s11 }
 0x1b2   : > { %s2253_s11 = smov %s1919_s0  ;;  %s2254_s12 = smov %s1692_s13 }
 0x1b3   : > { %s2255_s13 = smov %s1696_s14  ;;  %s2257_s15 = smov %s1704_s16 }
 0x1b4   : > { %s2256_s14 = smov %s2247_s8  ;;  %s2258_s16 = smov %s1708_s17 }
 0x1b5   : > { %s2259_s17 = smov %s1916_s2  ;;  %s2260_s18 = smov %s1720_s20 }
 0x1b6   : > { %s2261_s20 = smov %s2249_s27  ;;  %20 = sbr.rel (!%p2163_p2) target bundleno = 15 (0xf), region = 94 }
 0x1bb   :  { %1149 = vsyncpa [#allocation4], 1 }
 0x1bc   :  { %1151 = vsyncpa [#allocation4 + $0x1], 1 }
 0x1bd   :  { %1152 = vsyncpa [#allocation7], 1 }
 0x1be   :  { %1154 = vsyncpa [#allocation7 + $0x1], 1 }
 0x1bf   :  { %1155 = vsyncpa [#allocation5], 1 }
 0x1c0   :  { %1157 = vsyncpa [#allocation5 + $0x1], 1 }

</bundles_post_ra>
